<compile_context>
chip_gen: v7x
topology: tpu7x:2x2x1
jax: 0.10.0
libtpu: 0.0.40
codegen_flags: <defaults>
</compile_context>

<pallas_src>
import functools

import jax
import jax.numpy as jnp
from jax.experimental import pallas as pl
from jax.experimental.pallas import tpu as pltpu

_LANE = 128
_SUBLANE = 8


def _silog_partial_kernel(pred_ref, gt_ref, out_ref, sum_acc, sq_acc, *,
                          block_rows, blocks_per_chunk, total_rows,
                          needs_mask):
    c = pl.program_id(0)   # chunk ("parallel" -> one per TensorCore on v7x)
    j = pl.program_id(1)   # reduction step within the chunk ("arbitrary")

    @pl.when(j == 0)
    def _():
        sum_acc[...] = jnp.zeros_like(sum_acc)
        sq_acc[...] = jnp.zeros_like(sq_acc)

    # Native-dtype load, upcast for accumulation.
    p = pred_ref[...].astype(jnp.float32)
    g = gt_ref[...].astype(jnp.float32)

    def accumulate(pv, gv):
        # log(pred*ratio) - log(gt*ratio) == log(pred) - log(gt): the ratio
        # cancels exactly, saving two VPU multiplies per element.
        d = jnp.log(pv) - jnp.log(gv)
        # Per-block tree sum: vreg-wise VPU adds over the leading axis, then a
        # single += into the one-vreg persistent accumulators.  Keeps
        # accumulation error comparable to a block-sized accumulator.
        d3 = d.reshape(block_rows // _SUBLANE, _SUBLANE, _LANE)
        sum_acc[...] += d3.sum(axis=0)
        sq_acc[...] += (d3 * d3).sum(axis=0)

    if needs_mask:
        # Logical (unclamped) global block start row; rows at/past
        # `total_rows` are overhang / re-read data and must contribute 0.
        row0 = (c * blocks_per_chunk + j) * block_rows
        is_edge = row0 + block_rows > total_rows

        @pl.when(jnp.logical_not(is_edge))
        def _():
            # Fast path: full in-range block, no mask work at all.
            accumulate(p, g)

        @pl.when(is_edge)
        def _():
            row_idx = row0 + jax.lax.broadcasted_iota(
                jnp.int32, (block_rows, _LANE), 0)
            valid = row_idx < total_rows
            # Select strictly BEFORE the log: edge-block data past
            # `total_rows` is undefined in VMEM and must never reach jnp.log.
            accumulate(jnp.where(valid, p, 1.0), jnp.where(valid, g, 1.0))
    else:
        accumulate(p, g)

    @pl.when(j == pl.num_programs(1) - 1)
    def _():
        # Lane-dense vreg stores; the cross-lane reduce happens in the wrapper.
        out_ref[0] = sum_acc[...]
        out_ref[1] = sq_acc[...]


def _default_num_chunks():
    # Two grid "chunks" only help on parts with 2 TensorCores per chip (v7x);
    # on single-TC v5e/v6e a second chunk is just a serial loop plus an extra
    # epilogue and more masking.  Probe defensively; fall back to 1.
    try:
        info = pltpu.get_tpu_info()
        for attr in ("num_tensorcores", "tensorcores_per_chip",
                     "num_cores_per_chip", "num_cores"):
            val = getattr(info, attr, None)
            if val:
                return max(1, min(2, int(val)))
    except Exception:
        pass
    return 1


def silog_loss(pred, gt, ratio=10.0, ratio2=0.85, *,
               max_block_rows=None, num_chunks=None):
    """Pallas-TPU SilogLoss forward. pred/gt: any matching shape (e.g. NCHW)."""
    assert pred.shape == gt.shape, (pred.shape, gt.shape)
    n = int(pred.size)
    assert n > 0
    itemsize = jnp.dtype(pred.dtype).itemsize

    if max_block_rows is None:
        # ~2 MiB per input block (4096 rows f32 / 8192 rows bf16): with 2
        # inputs x 2 pipeline buffers that's 8 MiB of VMEM -- inside every
        # generation's scoped-VMEM default (16 MiB v5e, 32 MiB v6e/v7x) --
        # while amortizing the ~0.35 us per-grid-step overhead.
        max_block_rows = (2 * 1024 * 1024) // (_LANE * itemsize)
    if num_chunks is None:
        num_chunks = _default_num_chunks()

    pred_f = pred.reshape(-1)
    gt_f = gt.reshape(-1)

    # Pad only up to one vreg (8x128 = 1024 elems) with 1.0 so log_diff == 0
    # there; no full-block host-side padding copy.  Keeps `rows` a multiple of
    # 8 so the in-kernel tree-sum reshape is a pure vreg view.
    rem = (-n) % (_SUBLANE * _LANE)
    if rem:
        pred_f = jnp.pad(pred_f, (0, rem), constant_values=1.0)
        gt_f = jnp.pad(gt_f, (0, rem), constant_values=1.0)
    rows = (n + rem) // _LANE

    pred2 = pred_f.reshape(rows, _LANE)
    gt2 = gt_f.reshape(rows, _LANE)

    block_rows = min(int(max_block_rows), rows)
    block_rows = max(_SUBLANE, (block_rows // _SUBLANE) * _SUBLANE)
    num_blocks = pl.cdiv(rows, block_rows)
    chunks = int(num_chunks) if num_blocks >= int(num_chunks) else 1
    blocks_per_chunk = pl.cdiv(num_blocks, chunks)
    needs_mask = (chunks * blocks_per_chunk * block_rows) != rows

    def in_index_map(c, j):
        # Clamp so the DMA never walks past the last real block; logically
        # out-of-range blocks are zeroed by the in-kernel edge mask.
        b = c * blocks_per_chunk + j
        return (jnp.minimum(b, num_blocks - 1), 0)

    kernel = functools.partial(
        _silog_partial_kernel,
        block_rows=block_rows,
        blocks_per_chunk=blocks_per_chunk,
        total_rows=rows,
        needs_mask=needs_mask,
    )

    cost = pl.CostEstimate(
        flops=5 * n,
        transcendentals=2 * n,
        bytes_accessed=2 * n * itemsize + chunks * 2 * _SUBLANE * _LANE * 4,
    )

    partials = pl.pallas_call(
        kernel,
        out_shape=jax.ShapeDtypeStruct((chunks, 2, _SUBLANE, _LANE),
                                       jnp.float32),
        grid_spec=pltpu.PrefetchScalarGridSpec(
            num_scalar_prefetch=0,
            grid=(chunks, blocks_per_chunk),
            in_specs=[
                pl.BlockSpec((block_rows, _LANE), in_index_map),
                pl.BlockSpec((block_rows, _LANE), in_index_map),
            ],
            # Leading (chunk) dim squeezed: kernel sees a (2, 8, 128) ref.
            out_specs=pl.BlockSpec((None, 2, _SUBLANE, _LANE),
                                   lambda c, j: (c, 0, 0, 0)),
            scratch_shapes=[
                pltpu.VMEM((_SUBLANE, _LANE), jnp.float32),  # sum(d)
                pltpu.VMEM((_SUBLANE, _LANE), jnp.float32),  # sum(d*d)
            ],
        ),
        compiler_params=pltpu.CompilerParams(
            dimension_semantics=("parallel", "arbitrary")),
        cost_estimate=cost,
    )(pred2, gt2)

    # Tiny per-chunk combine + final scalar math in the wrapper.
    total_sum = jnp.sum(partials[:, 0])
    total_sq = jnp.sum(partials[:, 1])

    inv_n = 1.0 / float(n)
    silog1 = total_sq * inv_n
    mean_d = total_sum * inv_n
    silog2 = float(ratio2) * mean_d * mean_d
    # Clamp: finite-precision accumulation can make silog1 - silog2 dip just
    # below 0 for near-constant log_diff, which would yield NaN.
    return jnp.sqrt(jnp.maximum(silog1 - silog2, 0.0)) * float(ratio)


def silog_loss_ref(pred, gt, ratio=10.0, ratio2=0.85):
    """Pure-JAX reference matching the PyTorch module."""
    log_diff = jnp.log(pred * ratio) - jnp.log(gt * ratio)
    silog1 = jnp.mean(log_diff ** 2)
    silog2 = ratio2 * jnp.mean(log_diff) ** 2
    return jnp.sqrt(silog1 - silog2) * ratio


if __name__ == "__main__":
    base = jax.random.PRNGKey(0)
    cases = [
        # (shape, dtype, kwargs)
        ((2, 4, 16, 16), jnp.float32, {}),                        # single-block path
        ((2, 3, 16, 32), jnp.float32,
         dict(max_block_rows=8, num_chunks=2)),                   # 2 chunks, clamped OOB block
        ((3, 4, 16, 16), jnp.float32,
         dict(max_block_rows=16, num_chunks=1)),                  # ragged edge block, gated mask
        ((5, 1, 7, 9), jnp.float32, {}),                          # vreg-tail padding path
        ((2, 4, 16, 16), jnp.bfloat16, {}),                       # bf16 passthrough
    ]
    for idx, (shape, dtype, kw) in enumerate(cases):
        k1, k2 = jax.random.split(jax.random.fold_in(base, idx))
        pred = jax.random.uniform(k1, shape, jnp.float32,
                                  minval=0.1, maxval=10.0).astype(dtype)
        gt = jax.random.uniform(k2, shape, jnp.float32,
                                minval=0.1, maxval=10.0).astype(dtype)
        loss = jax.block_until_ready(silog_loss(pred, gt, **kw))
        ref = jax.block_until_ready(
            silog_loss_ref(pred.astype(jnp.float32), gt.astype(jnp.float32)))
        assert jnp.allclose(loss, ref, rtol=1e-4, atol=1e-5), (idx, loss, ref)
    print("KERNEL_OK")
</pallas_src>

<mosaic_0001>
module attributes {stable_mosaic.version = 11 : i64} {
  func.func @_silog_partial_kernel(%arg0: i32, %arg1: i32, %arg2: memref<16x128xf32, #tpu.memory_space<vmem>>, %arg3: memref<16x128xf32, #tpu.memory_space<vmem>>, %arg4: memref<1x2x8x128xf32, #tpu.memory_space<vmem>>, %arg5: memref<8x128xf32, #tpu.memory_space<vmem>>, %arg6: memref<8x128xf32, #tpu.memory_space<vmem>>) attributes {dimension_semantics = [#tpu.dimension_semantics<parallel>, #tpu.dimension_semantics<arbitrary>], iteration_bounds = array<i64: 1, 1>, scalar_prefetch = 0 : i64, scratch_operands = 2 : i64, tpu.core_type = #tpu.core_type<tc>, window_params = [{transform_indices = @transform_0, window_bounds = array<i64: 16, 128>}, {transform_indices = @transform_1, window_bounds = array<i64: 16, 128>}, {transform_indices = @transform_2, window_bounds = array<i64: 1, 2, 8, 128>}]} {
    %c0_i32 = arith.constant 0 : i32
    %0 = arith.cmpi eq, %arg1, %c0_i32 : i32
    %1 = arith.extui %0 : i1 to i32
    %c0_i32_0 = arith.constant 0 : i32
    %2 = arith.cmpi ne, %1, %c0_i32_0 : i32
    scf.if %2 {
      %cst_15 = arith.constant 0.000000e+00 : f32
      %21 = vector.broadcast %cst_15 : f32 to vector<8x128xf32>
      %c0_16 = arith.constant 0 : index
      %c0_17 = arith.constant 0 : index
      %22 = vector.load %arg5[%c0_16, %c0_17] : memref<8x128xf32, #tpu.memory_space<vmem>>, vector<8x128xf32>
      tpu.vector_store %arg5[%c0_16, %c0_17], %21 {strides = array<i32>} : memref<8x128xf32, #tpu.memory_space<vmem>>, vector<8x128xf32>,
      %cst_18 = arith.constant 0.000000e+00 : f32
      %23 = vector.broadcast %cst_18 : f32 to vector<8x128xf32>
      %c0_19 = arith.constant 0 : index
      %c0_20 = arith.constant 0 : index
      %24 = vector.load %arg6[%c0_19, %c0_20] : memref<8x128xf32, #tpu.memory_space<vmem>>, vector<8x128xf32>
      tpu.vector_store %arg6[%c0_19, %c0_20], %23 {strides = array<i32>} : memref<8x128xf32, #tpu.memory_space<vmem>>, vector<8x128xf32>,
    } else {
    }
    %c0 = arith.constant 0 : index
    %c0_1 = arith.constant 0 : index
    %3 = vector.load %arg2[%c0, %c0_1] : memref<16x128xf32, #tpu.memory_space<vmem>>, vector<16x128xf32>
    %c0_2 = arith.constant 0 : index
    %c0_3 = arith.constant 0 : index
    %4 = vector.load %arg3[%c0_2, %c0_3] : memref<16x128xf32, #tpu.memory_space<vmem>>, vector<16x128xf32>
    %5 = math.log %3 : vector<16x128xf32>
    %6 = math.log %4 : vector<16x128xf32>
    %7 = arith.subf %5, %6 : vector<16x128xf32>
    %8 = vector.shape_cast %7 : vector<16x128xf32> to vector<2x8x128xf32>
    %c0_4 = arith.constant 0 : index
    %c0_5 = arith.constant 0 : index
    %9 = vector.load %arg5[%c0_4, %c0_5] : memref<8x128xf32, #tpu.memory_space<vmem>>, vector<8x128xf32>
    %cst = arith.constant dense<0.000000e+00> : vector<8x128xf32>
    %10 = vector.multi_reduction <add>, %8, %cst [0] : vector<2x8x128xf32> to vector<8x128xf32>
    %11 = arith.addf %9, %10 : vector<8x128xf32>
    %c0_6 = arith.constant 0 : index
    %c0_7 = arith.constant 0 : index
    %12 = vector.load %arg5[%c0_6, %c0_7] : memref<8x128xf32, #tpu.memory_space<vmem>>, vector<8x128xf32>
    tpu.vector_store %arg5[%c0_6, %c0_7], %11 {strides = array<i32>} : memref<8x128xf32, #tpu.memory_space<vmem>>, vector<8x128xf32>,
    %c0_8 = arith.constant 0 : index
    %c0_9 = arith.constant 0 : index
    %13 = vector.load %arg6[%c0_8, %c0_9] : memref<8x128xf32, #tpu.memory_space<vmem>>, vector<8x128xf32>
    %14 = arith.mulf %8, %8 : vector<2x8x128xf32>
    %cst_10 = arith.constant dense<0.000000e+00> : vector<8x128xf32>
    %15 = vector.multi_reduction <add>, %14, %cst_10 [0] : vector<2x8x128xf32> to vector<8x128xf32>
    %16 = arith.addf %13, %15 : vector<8x128xf32>
    %c0_11 = arith.constant 0 : index
    %c0_12 = arith.constant 0 : index
    %17 = vector.load %arg6[%c0_11, %c0_12] : memref<8x128xf32, #tpu.memory_space<vmem>>, vector<8x128xf32>
    tpu.vector_store %arg6[%c0_11, %c0_12], %16 {strides = array<i32>} : memref<8x128xf32, #tpu.memory_space<vmem>>, vector<8x128xf32>,
    %c0_i32_13 = arith.constant 0 : i32
    %18 = arith.cmpi eq, %arg1, %c0_i32_13 : i32
    %19 = arith.extui %18 : i1 to i32
    %c0_i32_14 = arith.constant 0 : i32
    %20 = arith.cmpi ne, %19, %c0_i32_14 : i32
    scf.if %20 {
      %c0_15 = arith.constant 0 : index
      %c0_16 = arith.constant 0 : index
      %21 = vector.load %arg5[%c0_15, %c0_16] : memref<8x128xf32, #tpu.memory_space<vmem>>, vector<8x128xf32>
      %c0_17 = arith.constant 0 : index
      %c0_18 = arith.constant 0 : index
      %c0_19 = arith.constant 0 : index
      %c0_20 = arith.constant 0 : index
      %22 = vector.load %arg4[%c0_17, %c0_18, %c0_19, %c0_20] : memref<1x2x8x128xf32, #tpu.memory_space<vmem>>, vector<1x1x8x128xf32>
      %23 = vector.shape_cast %22 : vector<1x1x8x128xf32> to vector<8x128xf32>
      %24 = vector.shape_cast %21 : vector<8x128xf32> to vector<1x1x8x128xf32>
      tpu.vector_store %arg4[%c0_17, %c0_18, %c0_19, %c0_20], %24 {strides = array<i32>} : memref<1x2x8x128xf32, #tpu.memory_space<vmem>>, vector<1x1x8x128xf32>,
      %c0_21 = arith.constant 0 : index
      %c0_22 = arith.constant 0 : index
      %25 = vector.load %arg6[%c0_21, %c0_22] : memref<8x128xf32, #tpu.memory_space<vmem>>, vector<8x128xf32>
      %c0_23 = arith.constant 0 : index
      %c1 = arith.constant 1 : index
      %c0_24 = arith.constant 0 : index
      %c0_25 = arith.constant 0 : index
      %26 = vector.load %arg4[%c0_23, %c1, %c0_24, %c0_25] : memref<1x2x8x128xf32, #tpu.memory_space<vmem>>, vector<1x1x8x128xf32>
      %27 = vector.shape_cast %26 : vector<1x1x8x128xf32> to vector<8x128xf32>
      %28 = vector.shape_cast %25 : vector<8x128xf32> to vector<1x1x8x128xf32>
      tpu.vector_store %arg4[%c0_23, %c1, %c0_24, %c0_25], %28 {strides = array<i32>} : memref<1x2x8x128xf32, #tpu.memory_space<vmem>>, vector<1x1x8x128xf32>,
    } else {
    }
    return
  }
  func.func @transform_0(%arg0: i32, %arg1: i32) -> (i32, i32) {
    %c1_i32 = arith.constant 1 : i32
    %0 = arith.muli %arg0, %c1_i32 : i32
    %1 = arith.addi %0, %arg1 : i32
    %c0_i32 = arith.constant 0 : i32
    %2 = arith.minsi %1, %c0_i32 : i32
    %c0_i32_0 = arith.constant 0 : i32
    %c0_i32_1 = arith.constant 0 : i32
    return %2, %c0_i32_0 : i32, i32
  }
  func.func @transform_1(%arg0: i32, %arg1: i32) -> (i32, i32) {
    %c1_i32 = arith.constant 1 : i32
    %0 = arith.muli %arg0, %c1_i32 : i32
    %1 = arith.addi %0, %arg1 : i32
    %c0_i32 = arith.constant 0 : i32
    %2 = arith.minsi %1, %c0_i32 : i32
    %c0_i32_0 = arith.constant 0 : i32
    %c0_i32_1 = arith.constant 0 : i32
    return %2, %c0_i32_0 : i32, i32
  }
  func.func @transform_2(%arg0: i32, %arg1: i32) -> (i32, i32, i32, i32) {
    %c0_i32 = arith.constant 0 : i32
    %c0_i32_0 = arith.constant 0 : i32
    %c0_i32_1 = arith.constant 0 : i32
    %c0_i32_2 = arith.constant 0 : i32
    return %arg0, %c0_i32, %c0_i32_0, %c0_i32_1 : i32, i32, i32, i32
  }
}

</mosaic_0001>

<bundles_post_ra>
// kernel: tpu_custom_call.1
= control target key start
LH: loop header
LB: loop body
LE: loop exit
PB: predicated region body
PF: predicated region fallthrough
CT: control target
= control target key end

     0   :  { %7 = vsyncpa [#allocation5], 0  ;;  %s270_s0 = inlined_call_operand.hbm [shape: f32[16,128], index: 0, kind: input, shape index: {}]   ;;  %s271_s1 = inlined_call_operand.hbm [shape: f32[16,128], index: 1, kind: input, shape index: {}]   ;;  %s272_s2 = inlined_call_operand.hbm [shape: f32[1,2,8,128], index: 2, kind: output, shape index: {}]  }
   0x1   :  { %8 = vsyncpa [#allocation8], 0 }
   0x2   :  { %9 = vsyncpa [#allocation6], 0  ;;  %s205_s9 = smov [#allocation4]   ;;  %s133_s13 = scalar_lea.hbm %s270_s0, 256 }
   0x3   :  { %s21_s10 = sshll.u32 %s205_s9, 4  ;;  %p134_p0 = scmp.ne.s32.totalorder %s270_s0, %s133_s13  ;;  %s22_s10 = int_to_ptr.vmem [resolvable:$true] %s21_s10 }
   0x4   :  { %p137_p1 = scmp.lt.u32.totalorder %s133_s13, %s270_s0 }
   0x6   :  { %p139_p2 = pnand %p137_p1, %p134_p0 }
   0x8   :  { %142 = shalt.err (!%p139_p2)
}
   0x9   :  { %s143_s18 = scalar_lea.vmem %s22_s10, 256  ;;  %p148_p4 = scmp.lt.s32.totalorder %s22_s10, %s22_s10 }
   0xa   :  { %p144_p3 = scmp.ne.s32.totalorder %s22_s10, %s143_s18  ;;  %p149_p5 = scmp.lt.s32.totalorder %s143_s18, %s143_s18 }
   0xc   :  { %p150_p6 = por %p149_p5, %p148_p4 }
   0xe   :  { %p151_p7 = pnand %p150_p6, %p144_p3 }
  0x10   :  { %154 = shalt.err (!%p151_p7)
}
  0x11   :  { %s206_s19 = smov 128   ;;  %s207_s20 = smov 8  }
  0x12   :  { %27 = dma.hbm_to_vmem [thread:$0]  %s270_s0, 256, %s22_s10, [#allocation5], %s206_s19, %s206_s19, %s207_s20  }
  0x13   :  { %s208_s23 = smov [#allocation7]   ;;  %s155_s27 = scalar_lea.hbm %s271_s1, 256 }
  0x14   :  { %s39_s24 = sshll.u32 %s208_s23, 4  ;;  %p156_p8 = scmp.ne.s32.totalorder %s271_s1, %s155_s27  ;;  %s40_s24 = int_to_ptr.vmem [resolvable:$true] %s39_s24 }
  0x15   :  { %p159_p9 = scmp.lt.u32.totalorder %s155_s27, %s271_s1 }
  0x17   :  { %p161_p10 = pnand %p159_p9, %p156_p8 }
  0x19   :  { %164 = shalt.err (!%p161_p10)
}
  0x1a   :  { %s165_s4 = scalar_lea.vmem %s40_s24, 256  ;;  %p170_p12 = scmp.lt.s32.totalorder %s40_s24, %s40_s24 }
  0x1b   :  { %p166_p11 = scmp.ne.s32.totalorder %s40_s24, %s165_s4  ;;  %p171_p13 = scmp.lt.s32.totalorder %s165_s4, %s165_s4 }
  0x1d   :  { %p172_p0 = por %p171_p13, %p170_p12 }
  0x1f   :  { %p173_p1 = pnand %p172_p0, %p166_p11 }
  0x21   :  { %176 = shalt.err (!%p173_p1)
}
  0x22   :  { %45 = dma.hbm_to_vmem [thread:$0]  %s271_s1, 256, %s40_s24, [#allocation8], %s206_s19, %s206_s19, %s207_s20  }
  0x23   :  { %199 = dma.done.wait [#allocation5], 256  }
  0x24   :  { %200 = vsyncadd [#allocation5], 4294967040 }
  0x25   :  { %201 = dma.done.wait [#allocation8], 256  }
  0x26   :  { %202 = vsyncadd [#allocation8], 4294967040  ;;  %v66_v0 = vld [vmem:[#allocation4] sm:$0xff]  ;;  %v67_v1 = vld [vmem:[#allocation4 + $0x8] sm:$0xff]  ;;  %s209_s1 = smov [#allocation9]  }
  0x27   :  { %v68_v2 = vld [vmem:[#allocation7] sm:$0xff]  ;;  %v69_v3 = vld [vmem:[#allocation7 + $0x8] sm:$0xff]  ;;  %125 = vlog2.f32 %v66_v0  ;;  %s103_s6 = sshll.u32 %s209_s1, 4  ;;  %s104_s6 = int_to_ptr.vmem [resolvable:$true] %s103_s6 }
  0x28   :  { %127 = vlog2.f32 %v67_v1  ;;  %s177_s7 = scalar_lea.vmem %s104_s6, 256  ;;  %p182_p3 = scmp.lt.s32.totalorder %s104_s6, %s104_s6 }
  0x29   :  { %129 = vlog2.f32 %v68_v2  ;;  %p178_p2 = scmp.ne.s32.totalorder %s104_s6, %s177_s7  ;;  %p183_p4 = scmp.lt.s32.totalorder %s177_s7, %s177_s7 }
  0x2a   :  { %131 = vlog2.f32 %v69_v3 }
  0x2b   :  { %p184_p5 = por %p183_p4, %p182_p3 }
  0x2d   :  { %p185_p6 = pnand %p184_p5, %p178_p2 }
  0x31   :  { %v126_v4 = vpop.eup %125 }
  0x32   :  { %v128_v5 = vpop.eup %127  ;;  %v71_v6 = vmul.f32 0.6931472, %v126_v4 }
  0x33   :  { %v130_v7 = vpop.eup %129  ;;  %v73_v8 = vmul.f32 0.6931472, %v128_v5 }
  0x34   :  { %v132_v9 = vpop.eup %131  ;;  %v75_v10 = vmul.f32 0.6931472, %v130_v7 }
  0x35   :  { %v77_v11 = vmul.f32 0.6931472, %v132_v9 }
  0x36   :  { %v78_v12 = vsub.f32 %v71_v6, %v75_v10 }
  0x37   :  { %v79_v13 = vsub.f32 %v73_v8, %v77_v11 }
  0x38   :  { %v85_v14 = vmul.f32 %v78_v12, %v78_v12 }
  0x39   :  { %v81_v15 = vadd.f32 %v79_v13, %v78_v12  ;;  %v86_v16 = vmul.f32 %v79_v13, %v79_v13 }
  0x3b   :  { %94 = vst [vmem:[#allocation9] sm:$0xff] %v81_v15  ;;  %v87_v17 = vadd.f32 %v86_v16, %v85_v14 }
  0x3d   :  { %97 = vst [vmem:[#allocation9 + $0x8] sm:$0xff] %v87_v17 }
  0x3e   :  { %188 = shalt.err (!%p185_p6)
}
  0x3f   :  { %s189_s10 = scalar_lea.hbm %s272_s2, 256 }
  0x40   :  { %p190_p7 = scmp.ne.s32.totalorder %s272_s2, %s189_s10  ;;  %p193_p8 = scmp.lt.u32.totalorder %s189_s10, %s272_s2 }
  0x42   :  { %p195_p9 = pnand %p193_p8, %p190_p7 }
  0x44   :  { %198 = shalt.err (!%p195_p9)
}
  0x45   :  { %109 = dma.vmem_to_hbm [thread:$0]  %s104_s6, 256, %s272_s2, [#allocation6], %s206_s19, %s206_s19, %s207_s20  }
  0x46   :  { %203 = dma.done.wait [#allocation6], 256  }
  0x47   :  { %204 = vsyncadd [#allocation6], 4294967040 }
  0x48   :  { %113 = vsyncpa [#allocation5], 1 }
  0x49   :  { %114 = vsyncpa [#allocation8], 1 }
  0x4a   :  { %115 = vsyncpa [#allocation6], 1 }

</bundles_post_ra>
